<compile_context>
chip_gen: v6e
topology: v6e:2x2x1
jax: 0.10.0
libtpu: 0.0.40
codegen_flags: <defaults>
</compile_context>

<pallas_src>
import numpy as np
import jax
import jax.numpy as jnp
from jax import lax
from jax.experimental import pallas as pl
from jax.experimental.pallas import tpu as pltpu


def _round_up(x, m):
    return (x + m - 1) // m * m


def _summarunner_kernel(
    blk_max_ref,    # SMEM (nb,) int32   -- scalar prefetch: max doc len per block
    sent_ref,       # VMEM (Lp, Bt, Dp)  encoder output, docs on sublanes
    invn_ref,       # VMEM (Bt, 1)       1 / doc_len per doc
    fc_wt_ref,      # VMEM (Dp, Dp)      fc.weight.T (zero padded)
    fc_b_ref,       # VMEM (1, Dp)       fc.bias
    sal_wt_ref,     # VMEM (Dp, Dp)      salience.weight[0].T
    nov_w_ref,      # VMEM (Dp, Dp)      novelty.weight[0]
    cont_w_ref,     # VMEM (1, Dp)       content.weight
    pos_ref,        # VMEM (Lp, Bt, 1)   abs_pos + rel_pos + bias per (pos, doc)
    out_ref,        # VMEM (Bt, Lout)    per-sentence probabilities (lane dense)
    u_scr,          # VMEM (Lp, Bt, Dp)  scratch: U = sent @ Wn
    stat_scr,       # VMEM (Lp, Bt, 1)   scratch: static score column
):
    g = pl.program_id(0)
    Lp, Bt, Dp = u_scr.shape
    Lout = out_ref.shape[1]

    sent = sent_ref[...]                                          # (Lp, Bt, Dp)

    # ---- avg_pool1d over valid sentences (padding rows pre-zeroed) ----------
    doc_mean = jnp.sum(sent, axis=0) * invn_ref[...]              # (Bt, Dp)

    # ---- doc = tanh(fc(doc_mean));  salience vector = doc @ Ws^T ------------
    doc = jnp.tanh(
        jnp.dot(doc_mean, fc_wt_ref[...],
                preferred_element_type=jnp.float32) + fc_b_ref[...])
    sal_vec = jnp.dot(doc, sal_wt_ref[...],
                      preferred_element_type=jnp.float32)         # (Bt, Dp)

    # ---- static score column: content + salience + (abs/rel pos + bias) -----
    comb = sal_vec + cont_w_ref[...]                              # (Bt, Dp)
    stat_scr[...] = (jnp.sum(sent * comb[None, :, :], axis=-1, keepdims=True)
                     + pos_ref[...])                              # (Lp, Bt, 1)

    # ---- hoisted novelty matmul on the MXU: U[p, b, :] = h_{p,b} @ Wn --------
    u2d = jnp.dot(sent.reshape(Lp * Bt, Dp), nov_w_ref[...],
                  preferred_element_type=jnp.float32)             # (Lp*Bt, Dp)
    u_scr[...] = u2d.reshape(Lp, Bt, Dp)

    # ---- sequential recurrence, vectorized over Bt docs on sublanes ---------
    lane = lax.broadcasted_iota(jnp.int32, (Bt, Lout), 1)

    def body(p, carry):
        s, probs = carry
        t = jnp.tanh(s)                                           # (Bt, Dp) EUP
        nov = jnp.sum(u_scr[p] * t, axis=-1, keepdims=True)       # (Bt, 1)  XLU
        prob = jax.nn.sigmoid(stat_scr[p] - nov)                  # (Bt, 1)  EUP
        s = s + prob * sent_ref[p]                                # FMA
        probs = jnp.where(lane == p, prob, probs)                 # place col p
        return s, probs

    s0 = jnp.zeros((Bt, Dp), jnp.float32)
    pr0 = jnp.zeros((Bt, Lout), jnp.float32)
    _, probs = lax.fori_loop(0, blk_max_ref[g], body, (s0, pr0))

    out_ref[...] = probs                                          # lane-dense store


def summarunner_forward(sent_out, doc_lens, params, *, block_docs=8):
    """Returns padded per-sentence probabilities of shape (B, L)."""
    B, L, D = sent_out.shape
    Pn = params["abs_emb"].shape[0]
    Sn = params["rel_emb"].shape[0]
    assert L <= Pn, "abs_pos_embed table must cover every position"
    Bt = block_docs
    assert Bt % 8 == 0, "block_docs must be a multiple of the sublane width"

    f32 = jnp.float32
    Dp = _round_up(D, 128)          # lane-pad features (helps v5e's 128x128 MXU)
    Lp = _round_up(L, 8)            # sublane-align the position axis
    Lout = _round_up(L, 128)        # lane-dense output width
    Bp = _round_up(B, Bt)
    nb = Bp // Bt

    doc_lens = jnp.clip(doc_lens.astype(jnp.int32), 0, L)
    n_safe = jnp.maximum(doc_lens, 1)          # guard doc_len == 0

    # ---- positional + bias scores (independent of encoder content) ----------
    abs_scores = params["abs_emb"][:L].astype(f32) @ params["abs_w"][0].astype(f32)
    rel_table = params["rel_emb"].astype(f32) @ params["rel_w"][0].astype(f32)
    pos = jnp.arange(L, dtype=f32)[None, :]
    rel_idx = jnp.clip(
        jnp.round((pos + 1.0) * 9.0 / n_safe.astype(f32)[:, None]).astype(jnp.int32),
        0, Sn - 1)
    pos_scores = (abs_scores[None, :] + rel_table[rel_idx]
                  + params["bias"][0].astype(f32))                 # (B, L)

    # ---- zero invalid sentence rows; pad B / L / D ---------------------------
    valid = (jnp.arange(L)[None, :] < doc_lens[:, None]).astype(f32)
    sent = sent_out.astype(f32) * valid[:, :, None]
    sent = jnp.pad(sent, ((0, Bp - B), (0, Lp - L), (0, Dp - D)))
    pos_scores = jnp.pad(pos_scores, ((0, Bp - B), (0, Lp - L)))

    # ---- (position, doc, feature) layout: docs on sublanes, feats on lanes ---
    sent_t = (sent.reshape(nb, Bt, Lp, Dp)
                  .transpose(0, 2, 1, 3)
                  .reshape(nb * Lp, Bt, Dp))
    pos_t = (pos_scores.reshape(nb, Bt, Lp)
                       .transpose(0, 2, 1)
                       .reshape(nb * Lp, Bt, 1))

    inv_len = 1.0 / n_safe.astype(f32)
    inv_len = jnp.pad(inv_len, (0, Bp - B), constant_values=1.0).reshape(Bp, 1)

    dl_pad = jnp.pad(doc_lens, (0, Bp - B), constant_values=1)
    blk_max = dl_pad.reshape(nb, Bt).max(axis=1).astype(jnp.int32)  # (nb,)

    def pad2(w, r, c):
        w = jnp.asarray(w, f32)
        return jnp.pad(w, ((0, r - w.shape[0]), (0, c - w.shape[1])))

    fc_wt = pad2(params["fc_w"].T, Dp, Dp)
    fc_b = pad2(params["fc_b"].reshape(1, D), 1, Dp)
    sal_wt = pad2(params["sal_w"][0].T, Dp, Dp)
    nov_w = pad2(params["nov_w"][0], Dp, Dp)
    cont_w = pad2(params["content_w"].reshape(1, D), 1, Dp)

    grid_spec = pltpu.PrefetchScalarGridSpec(
        num_scalar_prefetch=1,
        grid=(nb,),
        in_specs=[
            pl.BlockSpec((Lp, Bt, Dp), lambda g, bm: (g, 0, 0)),   # sent
            pl.BlockSpec((Bt, 1), lambda g, bm: (g, 0)),           # 1 / doc_len
            pl.BlockSpec((Dp, Dp), lambda g, bm: (0, 0)),          # fc.weight.T
            pl.BlockSpec((1, Dp), lambda g, bm: (0, 0)),           # fc.bias
            pl.BlockSpec((Dp, Dp), lambda g, bm: (0, 0)),          # salience.T
            pl.BlockSpec((Dp, Dp), lambda g, bm: (0, 0)),          # novelty
            pl.BlockSpec((1, Dp), lambda g, bm: (0, 0)),           # content
            pl.BlockSpec((Lp, Bt, 1), lambda g, bm: (g, 0, 0)),    # pos + bias
        ],
        out_specs=pl.BlockSpec((Bt, Lout), lambda g, bm: (g, 0)),
        scratch_shapes=[
            pltpu.VMEM((Lp, Bt, Dp), f32),   # U = sent @ Wn
            pltpu.VMEM((Lp, Bt, 1), f32),    # static score column
        ],
    )

    out = pl.pallas_call(
        _summarunner_kernel,
        out_shape=jax.ShapeDtypeStruct((Bp, Lout), f32),
        grid_spec=grid_spec,
        compiler_params=pltpu.CompilerParams(
            dimension_semantics=("parallel",)),
    )(blk_max, sent_t, inv_len, fc_wt, fc_b, sal_wt, nov_w, cont_w, pos_t)

    return out[:B, :L]                                             # (B, L)


def _reference_numpy(sent_out, doc_lens, params):
    """Pure-numpy (float64) reference of the PyTorch forward."""
    B, L, D = sent_out.shape
    out = []
    for i in range(B):
        n = int(doc_lens[i])
        valid = sent_out[i, :n, :].astype(np.float64)
        doc_mean = valid.mean(axis=0)
        doc = np.tanh(doc_mean @ params["fc_w"].T.astype(np.float64)
                      + params["fc_b"].astype(np.float64))
        s = np.zeros((D,), np.float64)
        for p in range(n):
            h = sent_out[i, p].astype(np.float64)
            content = h @ params["content_w"][0].astype(np.float64)
            salience = h @ params["sal_w"][0].astype(np.float64) @ doc
            novelty = -(h @ params["nov_w"][0].astype(np.float64) @ np.tanh(s))
            abs_p = params["abs_emb"][p].astype(np.float64) @ params["abs_w"][0]
            rel_idx = int(round((p + 1) * 9.0 / n))
            rel_p = params["rel_emb"][rel_idx].astype(np.float64) @ params["rel_w"][0]
            logit = (content + salience + novelty + abs_p + rel_p
                     + params["bias"][0])
            prob = 1.0 / (1.0 + np.exp(-logit))
            s = s + prob * h
            out.append(prob)
    return np.asarray(out, dtype=np.float32)


if __name__ == "__main__":
    # Small shapes consistent with the module: 16 documents (2 grid steps of 8
    # docs each), up to 8 sentences, hidden_dim=32 -> D=64, pos_dim=16.
    B, L = 16, 8
    hidden_dim = 32
    D = 2 * hidden_dim
    pos_dim = 16
    pos_num = 16          # >= max_doc_len
    seg_num = 16          # rel_index ranges over [0, 9]

    key = jax.random.PRNGKey(0)
    ks = jax.random.split(key, 11)

    doc_lens_py = [8, 5, 3, 8, 1, 7, 6, 4, 8, 2, 5, 8, 7, 3, 6, 8]
    doc_lens = jnp.asarray(doc_lens_py, dtype=jnp.int32)

    # Encoder output stand-in (see TODO(synk) above).
    sent_out = jax.random.normal(ks[0], (B, L, D), jnp.float32)

    sc = 1.0 / np.sqrt(D)
    sp = 1.0 / np.sqrt(pos_dim)
    params = {
        "abs_emb":   jax.random.normal(ks[1], (pos_num, pos_dim), jnp.float32),
        "rel_emb":   jax.random.normal(ks[2], (seg_num, pos_dim), jnp.float32),
        "fc_w":      jax.random.normal(ks[3], (D, D), jnp.float32) * sc,
        "fc_b":      jax.random.normal(ks[4], (D,), jnp.float32) * sc,
        "content_w": jax.random.normal(ks[5], (1, D), jnp.float32) * sc,
        "sal_w":     jax.random.normal(ks[6], (1, D, D), jnp.float32) * sc,
        "nov_w":     jax.random.normal(ks[7], (1, D, D), jnp.float32) * sc,
        "abs_w":     jax.random.normal(ks[8], (1, pos_dim), jnp.float32) * sp,
        "rel_w":     jax.random.normal(ks[9], (1, pos_dim), jnp.float32) * sp,
        "bias":      jax.random.uniform(ks[10], (1,), jnp.float32, -0.1, 0.1),
    }

    probs_padded = summarunner_forward(sent_out, doc_lens, params)
    # torch.cat(probs).squeeze(): concatenate valid-position probs per doc.
    probs = jnp.concatenate(
        [probs_padded[i, :doc_lens_py[i]] for i in range(B)])
    probs = jax.block_until_ready(probs)

    ref = _reference_numpy(np.asarray(sent_out), doc_lens_py,
                           {k: np.asarray(v) for k, v in params.items()})
    # Tolerance accounts for default-precision (single-pass bf16) MXU matmuls
    # vs. a float64 reference, compounded through the 8-step recurrence.
    np.testing.assert_allclose(np.asarray(probs), ref, rtol=5e-2, atol=5e-2)
    print("KERNEL_OK")
</pallas_src>

<mosaic_0001>
module attributes {stable_mosaic.version = 11 : i64} {
  func.func @_summarunner_kernel(%arg0: i32, %arg1: memref<2xi32, #tpu.memory_space<smem>>, %arg2: memref<8x8x128xf32, #tpu.memory_space<vmem>>, %arg3: memref<8x1xf32, #tpu.memory_space<vmem>>, %arg4: memref<128x128xf32, #tpu.memory_space<vmem>>, %arg5: memref<1x128xf32, #tpu.memory_space<vmem>>, %arg6: memref<128x128xf32, #tpu.memory_space<vmem>>, %arg7: memref<128x128xf32, #tpu.memory_space<vmem>>, %arg8: memref<1x128xf32, #tpu.memory_space<vmem>>, %arg9: memref<8x8x1xf32, #tpu.memory_space<vmem>>, %arg10: memref<8x128xf32, #tpu.memory_space<vmem>>, %arg11: memref<8x8x128xf32, #tpu.memory_space<vmem>>, %arg12: memref<8x8x1xf32, #tpu.memory_space<vmem>>) attributes {dimension_semantics = [#tpu.dimension_semantics<parallel>], iteration_bounds = array<i64: 2>, scalar_prefetch = 1 : i64, scratch_operands = 2 : i64, tpu.core_type = #tpu.core_type<tc>, window_params = [{transform_indices = @transform_0, window_bounds = array<i64: 8, 8, 128>}, {transform_indices = @transform_1, window_bounds = array<i64: 8, 1>}, {pipeline_mode = #tpu.pipeline_mode<synchronous>, transform_indices = @transform_2, window_bounds = array<i64: 128, 128>}, {pipeline_mode = #tpu.pipeline_mode<synchronous>, transform_indices = @transform_3, window_bounds = array<i64: 1, 128>}, {pipeline_mode = #tpu.pipeline_mode<synchronous>, transform_indices = @transform_4, window_bounds = array<i64: 128, 128>}, {pipeline_mode = #tpu.pipeline_mode<synchronous>, transform_indices = @transform_5, window_bounds = array<i64: 128, 128>}, {pipeline_mode = #tpu.pipeline_mode<synchronous>, transform_indices = @transform_6, window_bounds = array<i64: 1, 128>}, {transform_indices = @transform_7, window_bounds = array<i64: 8, 8, 1>}, {transform_indices = @transform_8, window_bounds = array<i64: 8, 128>}]} {
    %c0 = arith.constant 0 : index
    %c0_0 = arith.constant 0 : index
    %c0_1 = arith.constant 0 : index
    %0 = vector.load %arg2[%c0, %c0_0, %c0_1] : memref<8x8x128xf32, #tpu.memory_space<vmem>>, vector<8x8x128xf32>
    %cst = arith.constant dense<0.000000e+00> : vector<8x128xf32>
    %1 = vector.multi_reduction <add>, %0, %cst [0] : vector<8x8x128xf32> to vector<8x128xf32>
    %c0_2 = arith.constant 0 : index
    %c0_3 = arith.constant 0 : index
    %2 = vector.load %arg3[%c0_2, %c0_3] : memref<8x1xf32, #tpu.memory_space<vmem>>, vector<8x1xf32>
    %3 = vector.broadcast %2 : vector<8x1xf32> to vector<8x128xf32>
    %4 = arith.mulf %1, %3 : vector<8x128xf32>
    %c0_4 = arith.constant 0 : index
    %c0_5 = arith.constant 0 : index
    %5 = vector.load %arg4[%c0_4, %c0_5] : memref<128x128xf32, #tpu.memory_space<vmem>>, vector<128x128xf32>
    %cst_6 = arith.constant dense<0.000000e+00> : vector<8x128xf32>
    %6 = tpu.matmul %4, %5, %cst_6 {dimension_numbers = #tpu.dot_dimension_numbers<[1], [0], [0], [1], [0, 0, 1, 1], [], []>} : vector<8x128xf32>, vector<128x128xf32>, vector<8x128xf32> -> vector<8x128xf32>
    %c0_7 = arith.constant 0 : index
    %c0_8 = arith.constant 0 : index
    %7 = vector.load %arg5[%c0_7, %c0_8] : memref<1x128xf32, #tpu.memory_space<vmem>>, vector<1x128xf32>
    %8 = vector.broadcast %7 : vector<1x128xf32> to vector<8x128xf32>
    %9 = arith.addf %6, %8 : vector<8x128xf32>
    %10 = math.tanh %9 : vector<8x128xf32>
    %c0_9 = arith.constant 0 : index
    %c0_10 = arith.constant 0 : index
    %11 = vector.load %arg6[%c0_9, %c0_10] : memref<128x128xf32, #tpu.memory_space<vmem>>, vector<128x128xf32>
    %cst_11 = arith.constant dense<0.000000e+00> : vector<8x128xf32>
    %12 = tpu.matmul %10, %11, %cst_11 {dimension_numbers = #tpu.dot_dimension_numbers<[1], [0], [0], [1], [0, 0, 1, 1], [], []>} : vector<8x128xf32>, vector<128x128xf32>, vector<8x128xf32> -> vector<8x128xf32>
    %c0_12 = arith.constant 0 : index
    %c0_13 = arith.constant 0 : index
    %13 = vector.load %arg8[%c0_12, %c0_13] : memref<1x128xf32, #tpu.memory_space<vmem>>, vector<1x128xf32>
    %14 = vector.broadcast %13 : vector<1x128xf32> to vector<8x128xf32>
    %15 = arith.addf %12, %14 : vector<8x128xf32>
    %16 = vector.shape_cast %15 : vector<8x128xf32> to vector<1x8x128xf32>
    %17 = vector.broadcast %16 : vector<1x8x128xf32> to vector<8x8x128xf32>
    %18 = arith.mulf %0, %17 : vector<8x8x128xf32>
    %cst_14 = arith.constant dense<0.000000e+00> : vector<8x8xf32>
    %19 = vector.multi_reduction <add>, %18, %cst_14 [2] : vector<8x8x128xf32> to vector<8x8xf32>
    %20 = vector.shape_cast %19 : vector<8x8xf32> to vector<8x8x1xf32>
    %c0_15 = arith.constant 0 : index
    %c0_16 = arith.constant 0 : index
    %c0_17 = arith.constant 0 : index
    %21 = vector.load %arg9[%c0_15, %c0_16, %c0_17] : memref<8x8x1xf32, #tpu.memory_space<vmem>>, vector<8x8x1xf32>
    %22 = arith.addf %20, %21 : vector<8x8x1xf32>
    %c0_18 = arith.constant 0 : index
    %c0_19 = arith.constant 0 : index
    %c0_20 = arith.constant 0 : index
    %23 = vector.load %arg12[%c0_18, %c0_19, %c0_20] : memref<8x8x1xf32, #tpu.memory_space<vmem>>, vector<8x8x1xf32>
    tpu.vector_store %arg12[%c0_18, %c0_19, %c0_20], %22 {strides = array<i32>} : memref<8x8x1xf32, #tpu.memory_space<vmem>>, vector<8x8x1xf32>,
    %24 = vector.shape_cast %0 : vector<8x8x128xf32> to vector<64x128xf32>
    %c0_21 = arith.constant 0 : index
    %c0_22 = arith.constant 0 : index
    %25 = vector.load %arg7[%c0_21, %c0_22] : memref<128x128xf32, #tpu.memory_space<vmem>>, vector<128x128xf32>
    %cst_23 = arith.constant dense<0.000000e+00> : vector<64x128xf32>
    %26 = tpu.matmul %24, %25, %cst_23 {dimension_numbers = #tpu.dot_dimension_numbers<[1], [0], [0], [1], [0, 0, 1, 1], [], []>} : vector<64x128xf32>, vector<128x128xf32>, vector<64x128xf32> -> vector<64x128xf32>
    %27 = vector.shape_cast %26 : vector<64x128xf32> to vector<8x8x128xf32>
    %c0_24 = arith.constant 0 : index
    %c0_25 = arith.constant 0 : index
    %c0_26 = arith.constant 0 : index
    %28 = vector.load %arg11[%c0_24, %c0_25, %c0_26] : memref<8x8x128xf32, #tpu.memory_space<vmem>>, vector<8x8x128xf32>
    tpu.vector_store %arg11[%c0_24, %c0_25, %c0_26], %27 {strides = array<i32>} : memref<8x8x128xf32, #tpu.memory_space<vmem>>, vector<8x8x128xf32>,
    %29 = tpu.iota {dimensions = array<i32: 1>} : vector<8x128xi32>
    %cst_27 = arith.constant 0.000000e+00 : f32
    %30 = vector.broadcast %cst_27 : f32 to vector<8x128xf32>
    %cst_28 = arith.constant 0.000000e+00 : f32
    %31 = vector.broadcast %cst_28 : f32 to vector<8x128xf32>
    %32 = arith.index_cast %arg0 : i32 to index
    %33 = memref.load %arg1[%32] : memref<2xi32, #tpu.memory_space<smem>>
    %c0_i32 = arith.constant 0 : i32
    %34 = arith.subi %33, %c0_i32 : i32
    %35 = arith.addi %c0_i32, %34 : i32
    %c1_i32 = arith.constant 1 : i32
    %36:2 = scf.for %arg13 = %c0_i32 to %35 step %c1_i32 iter_args(%arg14 = %30, %arg15 = %31) -> (vector<8x128xf32>, vector<8x128xf32>)  : i32 {
      %38 = math.tanh %arg14 : vector<8x128xf32>
      %39 = arith.index_cast %arg13 : i32 to index
      %c0_31 = arith.constant 0 : index
      %c0_32 = arith.constant 0 : index
      %40 = vector.load %arg11[%39, %c0_31, %c0_32] : memref<8x8x128xf32, #tpu.memory_space<vmem>>, vector<1x8x128xf32>
      %41 = vector.shape_cast %40 : vector<1x8x128xf32> to vector<8x128xf32>
      %42 = arith.mulf %41, %38 : vector<8x128xf32>
      %cst_33 = arith.constant dense<0.000000e+00> : vector<8xf32>
      %43 = vector.multi_reduction <add>, %42, %cst_33 [1] : vector<8x128xf32> to vector<8xf32>
      %44 = vector.shape_cast %43 : vector<8xf32> to vector<8x1xf32>
      %45 = arith.index_cast %arg13 : i32 to index
      %c0_34 = arith.constant 0 : index
      %c0_35 = arith.constant 0 : index
      %46 = vector.load %arg12[%45, %c0_34, %c0_35] : memref<8x8x1xf32, #tpu.memory_space<vmem>>, vector<1x8x1xf32>
      %47 = vector.shape_cast %46 : vector<1x8x1xf32> to vector<8x1xf32>
      %48 = arith.subf %47, %44 : vector<8x1xf32>
      %49 = arith.negf %48 : vector<8x1xf32>
      %50 = math.exp %49 : vector<8x1xf32>
      %cst_36 = arith.constant 1.000000e+00 : f32
      %51 = vector.broadcast %cst_36 : f32 to vector<8x1xf32>
      %52 = arith.addf %51, %50 : vector<8x1xf32>
      %53 = arith.divf %51, %52 : vector<8x1xf32>
      %54 = arith.index_cast %arg13 : i32 to index
      %c0_37 = arith.constant 0 : index
      %c0_38 = arith.constant 0 : index
      %55 = vector.load %arg2[%54, %c0_37, %c0_38] : memref<8x8x128xf32, #tpu.memory_space<vmem>>, vector<1x8x128xf32>
      %56 = vector.shape_cast %55 : vector<1x8x128xf32> to vector<8x128xf32>
      %57 = vector.broadcast %53 : vector<8x1xf32> to vector<8x128xf32>
      %58 = arith.mulf %57, %56 : vector<8x128xf32>
      %59 = arith.addf %arg14, %58 : vector<8x128xf32>
      %60 = vector.broadcast %arg13 : i32 to vector<8x128xi32>
      %61 = arith.cmpi eq, %29, %60 : vector<8x128xi32>
      %62 = vector.shape_cast %53 : vector<8x1xf32> to vector<8x1xf32>
      %63 = vector.broadcast %62 : vector<8x1xf32> to vector<8x128xf32>
      %64 = arith.select %61, %63, %arg15 : vector<8x128xi1>, vector<8x128xf32>
      scf.yield %59, %64 : vector<8x128xf32>, vector<8x128xf32>
    }
    %c0_29 = arith.constant 0 : index
    %c0_30 = arith.constant 0 : index
    %37 = vector.load %arg10[%c0_29, %c0_30] : memref<8x128xf32, #tpu.memory_space<vmem>>, vector<8x128xf32>
    tpu.vector_store %arg10[%c0_29, %c0_30], %36#1 {strides = array<i32>} : memref<8x128xf32, #tpu.memory_space<vmem>>, vector<8x128xf32>,
    return
  }
  func.func @transform_0(%arg0: i32, %arg1: memref<2xi32, #tpu.memory_space<smem>>) -> (i32, i32, i32) {
    %c0_i32 = arith.constant 0 : i32
    %c0_i32_0 = arith.constant 0 : i32
    %c0_i32_1 = arith.constant 0 : i32
    return %arg0, %c0_i32, %c0_i32_0 : i32, i32, i32
  }
  func.func @transform_1(%arg0: i32, %arg1: memref<2xi32, #tpu.memory_space<smem>>) -> (i32, i32) {
    %c0_i32 = arith.constant 0 : i32
    %c0_i32_0 = arith.constant 0 : i32
    return %arg0, %c0_i32 : i32, i32
  }
  func.func @transform_2(%arg0: i32, %arg1: memref<2xi32, #tpu.memory_space<smem>>) -> (i32, i32) {
    %c0_i32 = arith.constant 0 : i32
    %c0_i32_0 = arith.constant 0 : i32
    %c0_i32_1 = arith.constant 0 : i32
    return %c0_i32, %c0_i32_0 : i32, i32
  }
  func.func @transform_3(%arg0: i32, %arg1: memref<2xi32, #tpu.memory_space<smem>>) -> (i32, i32) {
    %c0_i32 = arith.constant 0 : i32
    %c0_i32_0 = arith.constant 0 : i32
    %c0_i32_1 = arith.constant 0 : i32
    return %c0_i32, %c0_i32_0 : i32, i32
  }
  func.func @transform_4(%arg0: i32, %arg1: memref<2xi32, #tpu.memory_space<smem>>) -> (i32, i32) {
    %c0_i32 = arith.constant 0 : i32
    %c0_i32_0 = arith.constant 0 : i32
    %c0_i32_1 = arith.constant 0 : i32
    return %c0_i32, %c0_i32_0 : i32, i32
  }
  func.func @transform_5(%arg0: i32, %arg1: memref<2xi32, #tpu.memory_space<smem>>) -> (i32, i32) {
    %c0_i32 = arith.constant 0 : i32
    %c0_i32_0 = arith.constant 0 : i32
    %c0_i32_1 = arith.constant 0 : i32
    return %c0_i32, %c0_i32_0 : i32, i32
  }
  func.func @transform_6(%arg0: i32, %arg1: memref<2xi32, #tpu.memory_space<smem>>) -> (i32, i32) {
    %c0_i32 = arith.constant 0 : i32
    %c0_i32_0 = arith.constant 0 : i32
    %c0_i32_1 = arith.constant 0 : i32
    return %c0_i32, %c0_i32_0 : i32, i32
  }
  func.func @transform_7(%arg0: i32, %arg1: memref<2xi32, #tpu.memory_space<smem>>) -> (i32, i32, i32) {
    %c0_i32 = arith.constant 0 : i32
    %c0_i32_0 = arith.constant 0 : i32
    %c0_i32_1 = arith.constant 0 : i32
    return %arg0, %c0_i32, %c0_i32_0 : i32, i32, i32
  }
  func.func @transform_8(%arg0: i32, %arg1: memref<2xi32, #tpu.memory_space<smem>>) -> (i32, i32) {
    %c0_i32 = arith.constant 0 : i32
    %c0_i32_0 = arith.constant 0 : i32
    return %arg0, %c0_i32 : i32, i32
  }
}

</mosaic_0001>

<bundles_post_ra>
// kernel: tpu_custom_call.1
= control target key start
LH: loop header
LB: loop body
LE: loop exit
PB: predicated region body
PF: predicated region fallthrough
CT: control target
= control target key end

     0   :  { %s1822_s0 = inlined_call_operand.vmem [shape: s32[2], index: 0, kind: input, shape index: {}]   ;;  %s1823_s1 = inlined_call_operand.vmem [shape: f32[16,8,128], index: 1, kind: input, shape index: {}]   ;;  %s1824_s2 = inlined_call_operand.vmem [shape: f32[16,1], index: 2, kind: input, shape index: {}]   ;;  %s1825_s3 = inlined_call_operand.hbm [shape: f32[128,128], index: 3, kind: input, shape index: {}]   ;;  %s1826_s4 = inlined_call_operand.vmem [shape: f32[1,128], index: 4, kind: input, shape index: {}]   ;;  %s1827_s5 = inlined_call_operand.hbm [shape: f32[128,128], index: 5, kind: input, shape index: {}]   ;;  %s1828_s6 = inlined_call_operand.hbm [shape: f32[128,128], index: 6, kind: input, shape index: {}]   ;;  %s1829_s7 = inlined_call_operand.vmem [shape: f32[1,128], index: 7, kind: input, shape index: {}]   ;;  %s1830_s8 = inlined_call_operand.vmem [shape: f32[16,8,1], index: 8, kind: input, shape index: {}]   ;;  %s1831_s9 = inlined_call_operand.hbm [shape: f32[16,128], index: 9, kind: output, shape index: {}]  }
   0x1   :  { %s14_s11 = sshll.u32 %s1822_s0, 4  ;;  %s15_s11 = int_to_ptr.vmem [resolvable:$true] %s14_s11 }
   0x2   :  { %s1284_s12 = scalar_lea.vmem %s15_s11, 16  ;;  %p1289_p1 = scmp.lt.s32.totalorder %s15_s11, %s15_s11 }
   0x3   :  { %p1285_p0 = scmp.ne.s32.totalorder %s15_s11, %s1284_s12  ;;  %p1290_p2 = scmp.lt.s32.totalorder %s1284_s12, %s1284_s12 }
   0x5   :  { %p1291_p3 = por %p1290_p2, %p1289_p1 }
   0x7   :  { %p1292_p4 = pnand %p1291_p3, %p1285_p0 }
   0x9   :  { %1295 = shalt.err (!%p1292_p4)  }
   0xa   :  { %s1478_s13 = smov [#allocation5]  }
   0xb   :  { %17 = dma.vmem_to_smem %s15_s11, 16, %s1478_s13, [#allocation4] }
   0xc   :  { %1432 = dma.done.wait [#allocation4], 16 }
   0xd   :  { %1433 = vsyncadd [#allocation4], 4294967280 }
   0xe   :  { %19 = sfence }
   0xf   :  { %20 = vsyncpa [#allocation7], 0 }
  0x10   :  { %21 = vsyncpa [#allocation10], 0 }
  0x11   :  { %22 = vsyncpa [#allocation8], 0 }
  0x12   :  { %24 = vsyncpa [#allocation8 + $0x1], 0  ;;  %s1542_s14 = smov 0   ;;  %s1544_s0 = smov 0  }
  0x13   :  { %s1546_s15 = smov 0   ;;  %s1548_s16 = smov 0  }
  0x14 LB: > { %s1563_s17 = sadd.s32 4294967295, %s1460_s16   ;;  %s968_s18 = sadd.s32 4294967294, %s1460_s16   ;;  %s1460_s16 = sphi %s1548_s16, %s1847_s16   ;;  %s1456_s15 = sphi %s1546_s15, %s1846_s15   ;;  %s1452_s0 = sphi %s1544_s0, %s1845_s0   ;;  %s1448_s14 = sphi %s1542_s14, %s1844_s14  }
  0x15   : > { %s1567_s19 = sadd.s32 1, %s1460_s16   ;;  %s220_s20 = sadd.s32 1, %s1456_s15 }
  0x16   : > { %s217_s21 = ssub.s32 %s1460_s16, %s1567_s19  ;;  %p230_p5 = scmp.ne.s32.totalorder %s1456_s15, %s1452_s0 }
  0x17   : > { %p218_p6 = scmp.eq.s32.totalorder %s217_s21, 0  ;;  %p231_p7 = scmp.eq.s32.totalorder %s1563_s17, 1 }
  0x18   : > { %p236_p8 = scmp.ne.s32.totalorder %s1452_s0, %s1448_s14  ;;  %p237_p9 = scmp.eq.s32.totalorder %s968_s18, 1 }
  0x19   : > { %s1578_s22 = scalar_select %p218_p6, %s1456_s15, %s220_s20  }
  0x1a   : > { %p1580_p10 = por %p231_p7, %p230_p5  ;;  %p1584_p11 = por %p237_p9, %p236_p8 }
  0x1b   : > { %p969_p12 = scmp.ge.s32.totalorder %s1460_s16, 1  ;;  %p244_p13 = scmp.lt.s32.totalorder %s1460_s16, 3 }
  0x1c   : > { %s1834_s23 = scalar_select %p1580_p10, 1, 0 }
  0x1d   : > { %s1835_s24 = scalar_select %p1584_p11, 1, 0 }
  0x1e   : > { %p1832_p0 = scmp.eq.s32.totalorder %s1563_s17, 0  ;;  %p1591_p1 = pnand %p969_p12, %p244_p13 }
  0x1f   : > { %s1479_s26 = smov [#allocation9]   ;;  %s1480_s29 = smov [#allocation6]  }
  0x20   : > { %p1179_p2 = pneg %p1591_p1  ;;  %s272_s27 = sshll.u32 %s1479_s26, 4  ;;  %s273_s27 = int_to_ptr.vmem [resolvable:$true] %s272_s27 }
  0x21   : > { %s256_s30 = sshll.u32 %s1480_s29, 4  ;;  %s1481_s10 = smov [#allocation11]   ;;  %s257_s30 = int_to_ptr.vmem [resolvable:$true] %s256_s30 }
  0x22   : > { %p1599_p3 = pnand %p1832_p0, %p1179_p2  ;;  %s285_s11 = sshll.u32 %s1481_s10, 4  ;;  %s286_s11 = int_to_ptr.vmem [resolvable:$true] %s285_s11 }
  0x23   : > { %s1307_s12 = scalar_lea.vmem %s273_s27, 2048  ;;  %p1315_p8 = scmp.lt.s32.totalorder %s273_s27, %s273_s27 }
  0x24   : > { %p1298_p4 = pneg %p1599_p3  ;;  %p1308_p5 = scmp.ne.s32.totalorder %s273_s27, %s1307_s12 }
  0x25   : > { %p1316_p9 = scmp.lt.s32.totalorder %s1307_s12, %s1307_s12 }
  0x26   : > { %p1310_p6 = pnand %p1308_p5, %p1298_p4 }
  0x27   : > { %p1317_p12 = por %p1316_p9, %p1315_p8 }
  0x28   : > { %p1311_p7 = pneg %p1310_p6 }
  0x2a   : > { %p1318_p13 = pnand %p1317_p12, %p1311_p7 }
  0x2c   : > { %1321 = shalt.err (!%p1318_p13)
}
  0x2d   : > { %s1482_s13 = smov 128   ;;  %s1483_s18 = smov 8  }
  0x2e   : > { %1185 = dma.hbm_to_vmem [thread:$0]  (!%p1599_p3), %s1827_s5, 2048, %s273_s27, [#allocation10], %s1482_s13, %s1482_s13, %s1483_s18  }
  0x2f   : > { %s1333_s26 = scalar_lea.vmem %s257_s30, 2048  ;;  %p1341_p0 = scmp.lt.s32.totalorder %s257_s30, %s257_s30 }
  0x30   : > { %p1334_p2 = scmp.ne.s32.totalorder %s257_s30, %s1333_s26  ;;  %p1342_p11 = scmp.lt.s32.totalorder %s1333_s26, %s1333_s26 }
  0x32   : > { %p1336_p5 = pnand %p1334_p2, %p1298_p4  ;;  %p1343_p8 = por %p1342_p11, %p1341_p0 }
  0x34   : > { %p1337_p6 = pneg %p1336_p5 }
  0x36   : > { %p1344_p7 = pnand %p1343_p8, %p1337_p6 }
  0x38   : > { %1347 = shalt.err (!%p1344_p7)
}
  0x39   : > { %1182 = dma.hbm_to_vmem [thread:$0]  (!%p1599_p3), %s1825_s3, 2048, %s257_s30, [#allocation7], %s1482_s13, %s1482_s13, %s1483_s18  }
  0x3a   : > { %s1359_s27 = scalar_lea.vmem %s286_s11, 2048  ;;  %p1367_p2 = scmp.lt.s32.totalorder %s286_s11, %s286_s11 }
  0x3b   : > { %p1360_p9 = scmp.ne.s32.totalorder %s286_s11, %s1359_s27  ;;  %p1368_p5 = scmp.lt.s32.totalorder %s1359_s27, %s1359_s27 }
  0x3d   : > { %p1362_p12 = pnand %p1360_p9, %p1298_p4  ;;  %p1369_p10 = por %p1368_p5, %p1367_p2 }
  0x3f   : > { %p1363_p13 = pneg %p1362_p12 }
  0x41   : > { %p1370_p11 = pnand %p1369_p10, %p1363_p13 }
  0x43   : > { %1373 = shalt.err (!%p1370_p11)
}
  0x44   : > { %1188 = dma.hbm_to_vmem [thread:$0]  (!%p1599_p3), %s1828_s6, 2048, %s286_s11, [#allocation10], %s1482_s13, %s1482_s13, %s1483_s18  }
  0x45   : > { %329 = sbr.rel (%p1591_p1) target bundleno = 1122 (0x462), region = 52  ;;  %p1838_p0 = scmp.eq.s32.totalorder (!%p1591_p1), %s1563_s17, 0 }
  0x4a   : > { %1435 = dma.done.wait (%p1838_p0), [#allocation7], 2048   ;;  %p1839_p4 = pmov %p1838_p0 }
  0x4b   : > { %p1840_p6 = pmov %p1838_p0 }
  0x4c   : > { %1437 = vsyncadd (%p1839_p4), [#allocation7], 4294965248 }
  0x4d   : > { %1439 = dma.done.wait (%p1840_p6), [#allocation10], 4096   ;;  %p1841_p10 = pmov %p1838_p0 }
  0x4e   : > { %p386_p3 = scmp.lt.s32.totalorder %s1563_s17, 1  ;;  %s377_s25 = sand.u32 1, %s1452_s0   ;;  %v1484_v0 = vmov 0   ;;  %v1485_v1 = vmov 0.0   ;;  %vm1486_vm0 = vmmov 0   ;;  %v433_v3 = vld [vmem:[#allocation6 + $0x78] sm:$0xff] }
  0x4f   : > { %1441 = vsyncadd (%p1841_p10), [#allocation10], 4294963200  ;;  %s1642_s28 = sld [smem:[#allocation5 + %s1563_s17]]  ;;  %1274 = vset.pattern.permute.xlu0 %v1484_v0  ;;  %s1646_s30 = sshll.u32 %s377_s25, 3  ;;  %1051 = vmatprep.subr.mxu1 %v1485_v1  ;;  %v432_v4 = vld [vmem:[#allocation6 + $0x70] sm:$0xff]  ;;  %v431_v5 = vld [vmem:[#allocation6 + $0x68] sm:$0xff] }
  0x50   : > { %s387_s11 = scalar_select %p386_p3, %s1563_s17, 1  ;;  %1083 = vmatprep.mubr.msk.f32.mxu1 %vm1486_vm0, %v1485_v1  ;;  %1052 = vmatpush3.msra.mxu1 %v433_v3  ;;  %v430_v6 = vld [vmem:[#allocation6 + $0x60] sm:$0xff]  ;;  %v429_v8 = vld [vmem:[#allocation6 + $0x58] sm:$0xff]  ;;  %v428_v9 = vld [vmem:[#allocation6 + $0x50] sm:$0xff]  ;;  %vm645_vm1 = vcmask 7168  }
  0x51   : > { %s979_s13 = sshll.u32 %s1563_s17, 3  ;;  %1053 = vmatprep.subr.mxu1 %v1485_v1  ;;  %v427_v10 = vld [vmem:[#allocation6 + $0x48] sm:$0xff]  ;;  %v426_v11 = vld [vmem:[#allocation6 + $0x40] sm:$0xff]  ;;  %v425_v12 = vld [vmem:[#allocation6 + $0x38] sm:$0xff] }
  0x52   : > { %s981_s18 = sshll.u32 %s387_s11, 3  ;;  %p381_p1 = scmp.lt.s32.totalorder %s979_s13, 15  ;;  %1054 = vmatpush3.msra.mxu1 %v432_v4  ;;  %v424_v13 = vld [vmem:[#allocation6 + $0x30] sm:$0xff]  ;;  %v423_v14 = vld [vmem:[#allocation6 + $0x28] sm:$0xff]  ;;  %v422_v15 = vld [vmem:[#allocation6 + $0x20] sm:$0xff] }
  0x53   : > { %s389_s29 = scalar_lea.vmem %s1824_s2, %s981_s18  ;;  %1055 = vmatprep.subr.mxu1 %v1485_v1  ;;  %v421_v16 = vld [vmem:[#allocation6 + $0x18] sm:$0xff]  ;;  %v420_v17 = vld [vmem:[#allocation6 + $0x10] sm:$0xff]  ;;  %v419_v18 = vld [vmem:[#allocation6 + $0x8] sm:$0xff] }
  0x54   : > { %s1849_s13 = smov (!%p381_p1, %s979_s13), 15  ;;  %v411_v2 = vld [vmem:[%s389_s29] sm:$0xff]  ;;  %1056 = vmatpush3.msra.mxu1 %v431_v5  ;;  %v527_v36 = vld [vmem:[#allocation9 + $0x78] sm:$0xff]  ;;  %v526_v37 = vld [vmem:[#allocation9 + $0x70] sm:$0xff] }
  0x55   : > { %414 = vperm.xlu0 %1274, %v411_v2   ;;  %s980_s10 = sshll.u32 %s1849_s13, 3  ;;  %1057 = vmatprep.subr.mxu1 %v1485_v1  ;;  %v418_v19 = vld [vmem:[#allocation6] sm:$0xff]  ;;  %v525_v38 = vld [vmem:[#allocation9 + $0x68] sm:$0xff]  ;;  %v523_v40 = vld [vmem:[#allocation9 + $0x58] sm:$0xff]  ;;  %s379_s13 = scalar_lea.vmem [#allocation12], %s1646_s30 }
  0x56   : > { %s1665_s20 = scalar_lea.vmem %s1823_s1, %s980_s10  ;;  %1058 = vmatpush3.msra.mxu1 %v430_v6  ;;  %v524_v39 = vld [vmem:[#allocation9 + $0x60] sm:$0xff]  ;;  %v522_v41 = vld [vmem:[#allocation9 + $0x50] sm:$0xff]  ;;  %v521_v42 = vld [vmem:[#allocation9 + $0x48] sm:$0xff]  ;;  %s394_s12 = scalar_lea.vmem %s1830_s8, %s980_s10 }
  0x57   : > { %v1669_v7 = vld [vmem:[%s1665_s20] sm:$0xff]  ;;  %1059 = vmatprep.subr.mxu1 %v1485_v1  ;;  %v1687_v20 = vld [vmem:[%s1665_s20 + $0x8] sm:$0xff]  ;;  %v1692_v22 = vld [vmem:[%s1665_s20 + $0x10] sm:$0xff]  ;;  %p986_p8 = scmp.le.s32.totalorder %s1642_s28, 0 }
  0x58   : > { %1153 = vmatprep.mubr.f32.mxu0 %v1669_v7  ;;  %1060 = vmatpush3.msra.mxu1 %v429_v8  ;;  %v404_v21 = vadd.f32 %v1687_v20, %v1669_v7  ;;  %v1696_v24 = vld [vmem:[%s1665_s20 + $0x18] sm:$0xff]  ;;  %v1700_v26 = vld [vmem:[%s1665_s20 + $0x20] sm:$0xff]  ;;  %v1704_v28 = vld [vmem:[%s1665_s20 + $0x28] sm:$0xff]  ;;  %s1770_s10 = smov (!%p986_p8), 0  }
  0x59   : > { %1061 = vmatprep.subr.mxu1 %v1485_v1  ;;  %v1708_v30 = vld [vmem:[%s1665_s20 + $0x30] sm:$0xff]  ;;  %v1712_v32 = vld [vmem:[%s1665_s20 + $0x38] sm:$0xff]  ;;  %v520_v43 = vld [vmem:[#allocation9 + $0x40] sm:$0xff] }
  0x5a   : > { %1062 = vmatpush3.msra.mxu1 %v428_v9  ;;  %v405_v23 = vadd.f32 %v404_v21, %v1692_v22  ;;  %v519_v44 = vld [vmem:[#allocation9 + $0x38] sm:$0xff]  ;;  %v518_v45 = vld [vmem:[#allocation9 + $0x30] sm:$0xff]  ;;  %v517_v46 = vld [vmem:[#allocation9 + $0x28] sm:$0xff] }
  0x5b   : > { %1063 = vmatprep.subr.mxu1 %v1485_v1  ;;  %v516_v47 = vld [vmem:[#allocation9 + $0x20] sm:$0xff]  ;;  %v515_v48 = vld [vmem:[#allocation9 + $0x18] sm:$0xff]  ;;  %v514_v49 = vld [vmem:[#allocation9 + $0x10] sm:$0xff] }
  0x5c   : > { %1064 = vmatpush3.msra.mxu1 %v427_v10  ;;  %v406_v25 = vadd.f32 %v405_v23, %v1696_v24  ;;  %v513_v50 = vld [vmem:[#allocation9 + $0x8] sm:$0xff]  ;;  %v512_v51 = vld [vmem:[#allocation9] sm:$0xff]  ;;  %v669_v52 = vld [vmem:[#allocation11 + $0x78] sm:$0xff] }
  0x5d   : > { %1065 = vmatprep.subr.mxu1 %v1485_v1  ;;  %v668_v53 = vld [vmem:[#allocation11 + $0x70] sm:$0xff]  ;;  %1121 = vmatprep.subr.mxu0 %v669_v52  ;;  %v667_v54 = vld [vmem:[#allocation11 + $0x68] sm:$0xff]  ;;  %v666_v55 = vld [vmem:[#allocation11 + $0x60] sm:$0xff] }
  0x5e   : > { %1066 = vmatpush3.msra.mxu1 %v426_v11  ;;  %v407_v27 = vadd.f32 %v406_v25, %v1700_v26  ;;  %1122 = vmatpush3.msra.mxu0 %v669_v52  ;;  %v665_v56 = vld [vmem:[#allocation11 + $0x58] sm:$0xff]  ;;  %v664_v57 = vld [vmem:[#allocation11 + $0x50] sm:$0xff]  ;;  %v663_v58 = vld [vmem:[#allocation11 + $0x48] sm:$0xff] }
  0x5f   : > { %1067 = vmatprep.subr.mxu1 %v1485_v1  ;;  %1123 = vmatprep.subr.mxu0 %v668_v53  ;;  %v662_v59 = vld [vmem:[#allocation11 + $0x40] sm:$0xff]  ;;  %v661_v60 = vld [vmem:[#allocation11 + $0x38] sm:$0xff]  ;;  %v660_v61 = vld [vmem:[#allocation11 + $0x30] sm:$0xff] }
  0x60   : > { %1068 = vmatpush3.msra.mxu1 %v425_v12  ;;  %v408_v29 = vadd.f32 %v407_v27, %v1704_v28  ;;  %1124 = vmatpush3.msra.mxu0 %v668_v53  ;;  %v659_v62 = vld [vmem:[#allocation11 + $0x28] sm:$0xff]  ;;  %v658_v63 = vld [vmem:[#allocation11 + $0x20] sm:$0xff]  ;;  %v657_v0 = vld [vmem:[#allocation11 + $0x18] sm:$0xff] }
  0x61   : > { %1069 = vmatprep.subr.mxu1 %v1485_v1  ;;  %1125 = vmatprep.subr.mxu0 %v667_v54  ;;  %v655_v2 = vld [vmem:[#allocation11 + $0x8] sm:$0xff]  ;;  %v654_v3 = vld [vmem:[#allocation11] sm:$0xff]  ;;  %v636_v52 = vld [vmem:[%s394_s12 + $0x38] sm:$0xff] }
  0x62   : > { %1070 = vmatpush3.msra.mxu1 %v424_v13  ;;  %v409_v31 = vadd.f32 %v408_v29, %v1708_v30  ;;  %1126 = vmatpush3.msra.mxu0 %v667_v54  ;;  %v984_v4 = vld [vmem:[%s1826_s4] ss:$0 sm:$0xff]  ;;  %v783_v29 = vlaneseq }
  0x63   : > { %1071 = vmatprep.subr.mxu1 %v1485_v1  ;;  %1127 = vmatprep.subr.mxu0 %v666_v55  ;;  %v985_v10 = vld [vmem:[%s1829_s7] ss:$0 sm:$0xff] }
  0x64   : > { %1072 = vmatpush3.msra.mxu1 %v423_v14  ;;  %v410_v33 = vadd.f32 %v409_v31, %v1712_v32  ;;  %1128 = vmatpush3.msra.mxu0 %v666_v55  ;;  %v630_v31 = vld [vmem:[%s394_s12 + $0x8] sm:$0xff]  ;;  %v1474_v55 = vmov 0.0  }
  0x65   : > { %1073 = vmatprep.subr.mxu1 %v1485_v1  ;;  %1129 = vmatprep.subr.mxu0 %v665_v56 }
  0x66   : > { %1074 = vmatpush3.msra.mxu1 %v422_v15  ;;  %1130 = vmatpush3.msra.mxu0 %v665_v56 }
  0x67   : > { %1075 = vmatprep.subr.mxu1 %v1485_v1  ;;  %1131 = vmatprep.subr.mxu0 %v664_v57 }
  0x68   : > { %1076 = vmatpush3.msra.mxu1 %v421_v16  ;;  %1132 = vmatpush3.msra.mxu0 %v664_v57 }
  0x69   : > { %1077 = vmatprep.subr.mxu1 %v1485_v1  ;;  %1133 = vmatprep.subr.mxu0 %v663_v58 }
  0x6a   : > { %1078 = vmatpush3.msra.mxu1 %v420_v17  ;;  %1134 = vmatpush3.msra.mxu0 %v663_v58 }
  0x6b   : > { %1079 = vmatprep.subr.mxu1 %v1485_v1  ;;  %1135 = vmatprep.subr.mxu0 %v662_v59 }
  0x6c   : > { %1080 = vmatpush3.msra.mxu1 %v419_v18  ;;  %1136 = vmatpush3.msra.mxu0 %v662_v59 }
  0x6d   : > { %1081 = vmatprep.subr.mxu1 %v1485_v1  ;;  %1137 = vmatprep.subr.mxu0 %v661_v60 }
  0x6e   : > { %1082 = vmatpush3.msra.mxu1 %v418_v19  ;;  %1138 = vmatpush3.msra.mxu0 %v661_v60 }
  0x6f   : > { %1086 = vmatprep.subr.mxu1 %v1485_v1  ;;  %1139 = vmatprep.subr.mxu0 %v660_v61 }
  0x70   : > { %1140 = vmatpush3.msra.mxu0 %v660_v61 }
  0x71   : > { %1141 = vmatprep.subr.mxu0 %v659_v62 }
  0x72   : > { %1142 = vmatpush3.msra.mxu0 %v659_v62 }
  0x73   : > { %1143 = vmatprep.subr.mxu0 %v658_v63 }
  0x74   : > { %1144 = vmatpush3.msra.mxu0 %v658_v63 }
  0x75   : > { %1145 = vmatprep.subr.mxu0 %v657_v0 }
  0x76   : > { %1146 = vmatpush3.msra.mxu0 %v657_v0 }
  0xd0   : > { %v415_v34 = vpop.permute.xlu0 %414 }
  0xd1   : > { %v417_v35 = vmul.f32 %v415_v34, %v410_v33 }
  0xd3   : > { %1084 = vmatmul.mubr.f32.vlgmr.msra.gmra.mxu1 %v417_v35 }
  0xd4   : > { %1087 = vmatpush3.msra.mxu1 %v527_v36  ;;  %1118 = vmatprep.mubr.msk.f32.mxu1 %vm1486_vm0, %v1485_v1 }
  0xd5   : > { %1088 = vmatprep.subr.mxu1 %v1485_v1 }
  0xd6   : > { %1089 = vmatpush3.msra.mxu1 %v526_v37  ;;  %v631_v37 = vld [vmem:[%s394_s12 + $0x10] sm:$0xff] }
  0xd7   : > { %1090 = vmatprep.subr.mxu1 %v1485_v1 }
  0xd8   : > { %1091 = vmatpush3.msra.mxu1 %v525_v38 }
  0xd9   : > { %1092 = vmatprep.subr.mxu1 %v1485_v1 }
  0xda   : > { %1093 = vmatpush3.msra.mxu1 %v524_v39 }
  0xdb   : > { %1094 = vmatprep.subr.mxu1 %v1485_v1 }
  0xdc   : > { %1095 = vmatpush3.msra.mxu1 %v523_v40  ;;  %v632_v40 = vld [vmem:[%s394_s12 + $0x18] sm:$0xff] }
  0xdd   : > { %1096 = vmatprep.subr.mxu1 %v1485_v1 }
  0xde   : > { %1097 = vmatpush3.msra.mxu1 %v522_v41 }
  0xdf   : > { %1098 = vmatprep.subr.mxu1 %v1485_v1 }
  0xe0   : > { %1099 = vmatpush3.msra.mxu1 %v521_v42 }
  0xe1   : > { %1100 = vmatprep.subr.mxu1 %v1485_v1 }
  0xe2   : > { %1101 = vmatpush3.msra.mxu1 %v520_v43  ;;  %v633_v43 = vld [vmem:[%s394_s12 + $0x20] sm:$0xff] }
  0xe3   : > { %1102 = vmatprep.subr.mxu1 %v1485_v1 }
  0xe4   : > { %1103 = vmatpush3.msra.mxu1 %v519_v44 }
  0xe5   : > { %1104 = vmatprep.subr.mxu1 %v1485_v1 }
  0xe6   : > { %1105 = vmatpush3.msra.mxu1 %v518_v45 }
  0xe7   : > { %1106 = vmatprep.subr.mxu1 %v1485_v1 }
  0xe8   : > { %1107 = vmatpush3.msra.mxu1 %v517_v46  ;;  %v634_v46 = vld [vmem:[%s394_s12 + $0x28] sm:$0xff] }
  0xe9   : > { %1108 = vmatprep.subr.mxu1 %v1485_v1 }
  0xea   : > { %1109 = vmatpush3.msra.mxu1 %v516_v47 }
  0xeb   : > { %1110 = vmatprep.subr.mxu1 %v1485_v1 }
  0xec   : > { %1111 = vmatpush3.msra.mxu1 %v515_v48 }
  0xed   : > { %1112 = vmatprep.subr.mxu1 %v1485_v1 }
  0xee   : > { %1113 = vmatpush3.msra.mxu1 %v514_v49  ;;  %v635_v49 = vld [vmem:[%s394_s12 + $0x30] sm:$0xff] }
  0xef   : > { %1114 = vmatprep.subr.mxu1 %v1485_v1 }
  0xf0   : > { %1115 = vmatpush3.msra.mxu1 %v513_v50 }
  0xf1   : > { %1116 = vmatprep.subr.mxu1 %v1485_v1  ;;  %v656_v1 = vld [vmem:[#allocation11 + $0x10] sm:$0xff] }
  0xf2   : > { %1117 = vmatpush3.msra.mxu1 %v512_v51  ;;  %1147 = vmatprep.subr.mxu0 %v656_v1 }
  0xf3   : > { %1148 = vmatpush3.msra.mxu0 %v656_v1 }
  0xf4   : > { %1149 = vmatprep.subr.mxu0 %v655_v2 }
  0xf5   : > { %1150 = vmatpush3.msra.mxu0 %v655_v2 }
  0xf6   : > { %1151 = vmatprep.subr.mxu0 %v654_v3 }
  0xf7   : > { %1152 = vmatpush3.msra.mxu0 %v654_v3 }
  0xf8   : > { %1154 = vmatmul.mubr.f32.vlgmr.msra.gmra.mxu0 %v1687_v20 }
  0xf9   : > { %1156 = vmatprep.mubr.f32.mxu0 %v1692_v22 }
  0xfc   : > { %1157 = vmatmul.mubr.f32.gmra.mxu0 %v1696_v24 }
  0xfd   : > { %1159 = vmatprep.mubr.f32.mxu0 %v1700_v26 }
 0x100   : > { %1160 = vmatmul.mubr.f32.gmra.mxu0 %v1704_v28 }
 0x101   : > { %1162 = vmatprep.mubr.f32.mxu0 %v1708_v30 }
 0x104   : > { %1163 = vmatmul.mubr.f32.gmra.mxu0 %v1712_v32 }
 0x193   : > { %v507_v5 = vpop.f32.mrf.mxu1 }
 0x194   : > { %v508_v6 = vadd.f32 %v984_v4, %v507_v5 }
 0x195   : > { %v1085_v8 = vpop.f32.mrf.mxu1 }
 0x196   : > { %1275 = vtanh.f32 %v508_v6 }
 0x1a3   : > { %v1276_v9 = vpop.eup %1275 }
 0x1a4   : > { %1119 = vmatmul.mubr.f32.vlgmr.msra.gmra.mxu1 %v1276_v9 }
 0x264   : > { %v601_v11 = vpop.f32.mrf.mxu1 }
 0x265   : > { %v602_v12 = vadd.f32 %v985_v10, %v601_v11 }
 0x266   : > { %v1120_v13 = vpop.f32.mrf.mxu1 }
 0x267   : > { %v606_v14 = vmul.f32 %v602_v12, %v1687_v20  ;;  %v605_v15 = vmul.f32 %v602_v12, %v1669_v7  ;;  %v607_v16 = vmul.f32 %v602_v12, %v1692_v22  ;;  %v608_v17 = vmul.f32 %v602_v12, %v1696_v24  ;;  %v1155_v20 = vpop.f32.mrf.mxu0 }
 0x268   : > { %v609_v18 = vmul.f32 %v602_v12, %v1700_v26  ;;  %v610_v19 = vmul.f32 %v602_v12, %v1704_v28  ;;  %v611_v21 = vmul.f32 %v602_v12, %v1708_v30  ;;  %776 = vst [vmem:[#allocation2 + $0x8] sm:$0xff] %v1155_v20  ;;  %v612_v7 = vmul.f32 %v602_v12, %v1712_v32  ;;  %v629_v32 = vld [vmem:[%s394_s12] sm:$0xff] }
 0x269   : > { %615 = vadd.xlane.f32.xlu1 %v606_v14  ;;  %613 = vadd.xlane.f32.xlu0 %v605_v15  ;;  %v736_v23 = vpop.f32.mrf.mxu0  ;;  %v1753_v30 = vand.u32 127, %v783_v29 }
 0x26a   : > { %775 = vst [vmem:[#allocation2] sm:$0xff] %v736_v23 }
 0x26b   : > { %v1158_v22 = vpop.f32.mrf.mxu0 }
 0x26c   : > { %778 = vst [vmem:[#allocation2 + $0x18] sm:$0xff] %v1158_v22 }
 0x26d   : > { %617 = vadd.xlane.f32.xlu1 %v607_v16  ;;  %v746_v24 = vpop.f32.mrf.mxu0 }
 0x26e   : > { %777 = vst [vmem:[#allocation2 + $0x10] sm:$0xff] %v746_v24 }
 0x26f   : > { %v1161_v25 = vpop.f32.mrf.mxu0 }
 0x270   : > { %780 = vst [vmem:[#allocation2 + $0x28] sm:$0xff] %v1161_v25 }
 0x271   : > { %619 = vadd.xlane.f32.xlu1 %v608_v17  ;;  %v756_v26 = vpop.f32.mrf.mxu0 }
 0x272   : > { %779 = vst [vmem:[#allocation2 + $0x20] sm:$0xff] %v756_v26 }
 0x273   : > { %v1164_v27 = vpop.f32.mrf.mxu0 }
 0x274   : > { %782 = vst [vmem:[#allocation2 + $0x38] sm:$0xff] %v1164_v27 }
 0x275   : > { %621 = vadd.xlane.f32.xlu1 %v609_v18  ;;  %v766_v28 = vpop.f32.mrf.mxu0 }
 0x276   : > { %781 = vst [vmem:[#allocation2 + $0x30] sm:$0xff] %v766_v28 }
 0x279   : > { %623 = vadd.xlane.f32.xlu1 %v610_v19 }
 0x27d   : > { %625 = vadd.xlane.f32.xlu1 %v611_v21 }
 0x281   : > { %627 = vadd.xlane.f32.xlu1 %v612_v7 }
 0x2f2   : > { %v616_v33 = vpop.xlane.xlu1 %615  ;;  %v614_v34 = vpop.xlane.xlu0 %613 }
 0x2f3   : > { %v638_v35 = vadd.f32 %v630_v31, %v616_v33  ;;  %v637_v36 = vadd.f32 %v629_v32, %v614_v34 }
 0x2f5   : > { %647 = vst.msk [vmem:[#allocation3 + $0x8] sm:$0xff] %vm645_vm1, %v638_v35  ;;  %646 = vst.msk [vmem:[#allocation3] sm:$0xff] %vm645_vm1, %v637_v36 }
 0x2f6   : > { %v618_v38 = vpop.xlane.xlu1 %617 }
 0x2f7   : > { %v639_v39 = vadd.f32 %v631_v37, %v618_v38 }
 0x2f9   : > { %648 = vst.msk [vmem:[#allocation3 + $0x10] sm:$0xff] %vm645_vm1, %v639_v39 }
 0x2fa   : > { %v620_v41 = vpop.xlane.xlu1 %619 }
 0x2fb   : > { %v640_v42 = vadd.f32 %v632_v40, %v620_v41 }
 0x2fd   : > { %649 = vst.msk [vmem:[#allocation3 + $0x18] sm:$0xff] %vm645_vm1, %v640_v42 }
 0x2fe   : > { %v622_v44 = vpop.xlane.xlu1 %621 }
 0x2ff   : > { %v641_v45 = vadd.f32 %v633_v43, %v622_v44 }
 0x301   : > { %650 = vst.msk [vmem:[#allocation3 + $0x20] sm:$0xff] %vm645_vm1, %v641_v45 }
 0x302   : > { %v624_v47 = vpop.xlane.xlu1 %623 }
 0x303   : > { %v642_v48 = vadd.f32 %v634_v46, %v624_v47 }
 0x305   : > { %651 = vst.msk [vmem:[#allocation3 + $0x28] sm:$0xff] %vm645_vm1, %v642_v48 }
 0x306   : > { %v626_v50 = vpop.xlane.xlu1 %625 }
 0x307   : > { %v643_v51 = vadd.f32 %v635_v49, %v626_v50 }
 0x309   : > { %652 = vst.msk [vmem:[#allocation3 + $0x30] sm:$0xff] %vm645_vm1, %v643_v51  ;;  %901 = sbr.rel (%p986_p8) target bundleno = 1098 (0x44a), region = 110 }
 0x30a   : > { %v628_v53 = vpop.xlane.xlu1 %627 }
 0x30b   : > { %v644_v54 = vadd.f32 %v636_v52, %v628_v53 }
 0x30d   : > { %653 = vst.msk [vmem:[#allocation3 + $0x38] sm:$0xff] %vm645_vm1, %v644_v54 }
 0x30e   : > { %v1462_v56 = vmov 0.0   ;;  %v1466_v57 = vmov 0.0  }
 0x30f LB: >> { %1278 = vtanh.f32 %v1468_v57  ;;  %s987_s11 = sshll.u32 %s1472_s10, 3  ;;  %v1487_v61 = vmov 0   ;;  %v819_v5 = vstv %s1472_s10  ;;  %s789_s10 = sadd.s32 1, %s1472_s10   ;;  %s1472_s10 = sphi %s1770_s10, %s789_s10   ;;  %v1468_v57 = vphi %v1466_v57, %v818_v57   ;;  %v1464_v56 = vphi %v1462_v56, %v1463_v56  }
 0x310   : >> { %s796_s18 = scalar_lea.vmem [#allocation2], %s987_s11  ;;  %1277 = vset.pattern.permute.xlu0 %v1487_v61  ;;  %s801_s21 = scalar_lea.vmem [#allocation3], %s987_s11  ;;  %vm820_vm2 = vcmp.eq.s32.totalorder %v1753_v30, %v819_v5 }
 0x311   : >> { %v797_v58 = vld [vmem:[%s796_s18] sm:$0xff]  ;;  %s810_s26 = scalar_lea.vmem %s1665_s20, %s987_s11  ;;  %p788_p7 = scmp.ge.s32.totalorder %s789_s10, %s1642_s28 }
 0x312   : >> { %v811_v6 = vld [vmem:[%s810_s26] sm:$0xff] }
 0x314   : >> { %v802_v62 = vld [vmem:[%s801_s21] sm:$0xff] }
 0x31c   : >> { %v1279_v59 = vpop.eup %1278 }
 0x31d   : >> { %v798_v60 = vmul.f32 %v1279_v59, %v797_v58 }
 0x31f   : >> { %799 = vadd.xlane.f32.xlu0 %v798_v60 }
 0x3a8   : >> { %v800_v63 = vpop.xlane.xlu0 %799 }
 0x3a9   : >> { %v803_v0 = vsub.f32 %v802_v62, %v800_v63 }
 0x3ab   : >> { %v988_v1 = vmul.f32 -1.442695, %v803_v0 }
 0x3ad   : >> { %1280 = vpow2.f32 %v988_v1 }
 0x3ba   : >> { %v1281_v2 = vpop.eup %1280 }
 0x3bb   : >> { %v807_v3 = vadd.f32 1.0, %v1281_v2 }
 0x3bd   : >> { %1282 = vrcp.f32 %v807_v3 }
 0x3ca   : >> { %v1283_v4 = vpop.eup %1282 }
 0x3cb   : >> { %814 = vperm.xlu0 %1277, %v1283_v4  }
 0x445   : > { %791 = sbr.rel (!%p788_p7) target bundleno = 783 (0x30f), region = 116 }
 0x446   : >> { %v815_v8 = vpop.permute.xlu0 %814 }
 0x447   : >> { %v817_v9 = vmul.f32 %v815_v8, %v811_v6  ;;  %v821_v10 = vsel %vm820_vm2, %v815_v8, %v1464_v56  }
 0x448   : >> { %v1463_v56 = vmov %v821_v10   ;;  %v1475_v55 = vmov (%p788_p7), %v821_v10  }
 0x449   : >> { %v818_v57 = vadd.f32 %v1468_v57, %v817_v9  }
 0x44a PF: > { %822 = vst [vmem:[%s379_s13] sm:$0xff] %v1476_v55  ;;  %s990_s29 = sshll.u32 %s1563_s17, 7  ;;  %s837_s18 = sshll.u32 %s379_s13, 4  ;;  %v1476_v55 = vphi %v1474_v55, %v1475_v55   ;;  %s838_s18 = int_to_ptr.vmem [resolvable:$true] %s837_s18 }
 0x44b   : > { %s835_s11 = scalar_lea.hbm %s1831_s9, %s990_s29  ;;  %s824_s28 = scalar_lea.sflag [#allocation8], %s377_s25 }
 0x44c   : > { %s1374_s20 = scalar_lea.vmem %s838_s18, 128  ;;  %p1842_p12 = scmp.ne.s32.totalorder %s1834_s23, 0 }
 0x44d   : > { %p1375_p9 = scmp.ne.s32.totalorder %s838_s18, %s1374_s20  ;;  %s1488_s10 = smov [#allocation12]  }
 0x44e   : > { %s1378_s21 = sshll.u32 %s1488_s10, 4  ;;  %s1379_s21 = int_to_ptr.vmem [resolvable:$false] %s1378_s21 }
 0x44f   : > { %p1376_p13 = pnand %p1375_p9, %p1842_p12  ;;  %s1380_s26 = scalar_lea.vmem %s1379_s21, 256 }
 0x450   : > { %p1381_p5 = scmp.lt.s32.totalorder %s838_s18, %s1379_s21  ;;  %p1382_p11 = scmp.lt.s32.totalorder %s1380_s26, %s1374_s20 }
 0x451   : > { %p1377_p2 = pneg %p1376_p13 }
 0x452   : > { %p1383_p0 = por %p1382_p11, %p1381_p5 }
 0x454   : > { %p1384_p4 = pnand %p1383_p0, %p1377_p2 }
 0x456   : > { %1387 = shalt.err (!%p1384_p4)
}
 0x457   : > { %s1388_s17 = scalar_lea.hbm %s835_s11, 128  ;;  %s1392_s13 = scalar_lea.hbm %s1831_s9, 256 }
 0x458   : > { %p1389_p6 = scmp.ne.s32.totalorder %s835_s11, %s1388_s17  ;;  %p1393_p1 = scmp.lt.s32.totalorder %s835_s11, %s1831_s9 }
 0x459   : > { %p1394_p8 = scmp.lt.s32.totalorder %s1392_s13, %s1388_s17 }
 0x45a   : > { %p1390_p10 = pnand %p1389_p6, %p1842_p12 }
 0x45b   : > { %p1395_p7 = por %p1394_p8, %p1393_p1 }
 0x45c   : > { %p1391_p3 = pneg %p1390_p10 }
 0x45e   : > { %p1396_p9 = pnand %p1395_p7, %p1391_p3 }
 0x460   : > { %1399 = shalt.err (!%p1396_p9)
}
 0x461   : > { %1177 = dma.vmem_to_hbm [thread:$0]  (%p1842_p12), %s838_s18, 128, %s835_s11, %s824_s28  }
 0x462 PF: > { %p1199_p13 = scmp.ge.s32.totalorder %s1460_s16, 2  ;;  %s849_s12 = sand.u32 1, %s1448_s14  }
 0x463   : > { %p1843_p2 = scmp.ne.s32.totalorder %s1835_s24, 0  ;;  %s850_s20 = scalar_lea.sflag [#allocation8], %s849_s12 }
 0x465   : > { %p1190_p5 = pnand %p1199_p13, %p1843_p2 }
 0x467   : > { %p1191_p11 = pneg %p1190_p5 }
 0x469   : > { %1443 = dma.done.wait (%p1191_p11), %s850_s20, 128  }
 0x46a   : > { %1445 = vsyncadd (%p1191_p11), %s850_s20, 4294967168  ;;  %p27_p0 = scmp.ge.s32.totalorder %s1567_s19, 4   ;;  %s1844_s14 = smov %s1452_s0 }
 0x46b   : > { %s1845_s0 = smov %s1456_s15  ;;  %s1846_s15 = smov %s1578_s22 }
 0x46c   : > { %s1847_s16 = smov %s1567_s19  ;;  %29 = sbr.rel (!%p27_p0) target bundleno = 20 (0x14), region = 127 }
 0x471   :  { %855 = vsyncpa [#allocation7], 1 }
 0x472   :  { %857 = vsyncpa [#allocation7 + $0x1], 1 }
 0x473   :  { %858 = vsyncpa [#allocation10], 1 }
 0x474   :  { %859 = vsyncpa [#allocation8], 1 }
 0x475   :  { %861 = vsyncpa [#allocation8 + $0x1], 1 }

</bundles_post_ra>
